<compile_context>
chip_gen: v7x
topology: tpu7x:2x2x1
jax: 0.10.0
libtpu: 0.0.40
codegen_flags: <defaults>
</compile_context>

<pallas_src>
import functools

import jax
import jax.numpy as jnp
from jax.experimental import pallas as pl
from jax.experimental.pallas import tpu as pltpu


def _round_up(v, m):
    return (v + m - 1) // m * m


# ---------------------------------------------------------------------------
# Kernel 1: node-feature projection  h = x @ W   (bf16 MXU, f32 accumulate)
# ---------------------------------------------------------------------------
def _proj_kernel(x_ref, w_ref, h_ref):
    h_ref[...] = jnp.dot(x_ref[...], w_ref[...],
                         preferred_element_type=jnp.float32).astype(jnp.bfloat16)


# ---------------------------------------------------------------------------
# Kernel 2: dense masked multi-head attention over one destination-row tile
# ---------------------------------------------------------------------------
def _gat_attn_kernel(h_ref, asrc_ref, adst_ref, bias_ref, mask_ref, o_ref, *,
                     heads, f_k, tm, concat, apply_relu):
    # Destination rows of this tile, sliced from the resident h buffer
    # (no second DMA of the same data).
    row0 = pl.multiple_of(pl.program_id(0) * tm, 128)
    h_dst = h_ref[pl.ds(row0, tm), :]                             # (TM, H*F) bf16

    # Attention-score reductions as MXU matmuls with block-diagonal
    # (H*F, heads) matrices (instead of per-head VPU multiply + XLU reduce).
    s_src_all = jnp.dot(h_ref[...], asrc_ref[...],
                        preferred_element_type=jnp.float32)       # (Np, heads)
    s_dst_all = jnp.dot(h_dst, adst_ref[...],
                        preferred_element_type=jnp.float32)       # (TM, heads)

    # Additive mask built once per tile: 0 where an edge exists, -1e9 else.
    neg_bias = jnp.where(mask_ref[...] > 0,
                         jnp.float32(0.0), jnp.float32(-1e9))     # (TM, Np)

    head_outs = []
    for hd in range(heads):                    # heads is a static Python int
        s_src = jnp.transpose(s_src_all[:, hd:hd + 1])            # (1, Np)
        s_dst = s_dst_all[:, hd:hd + 1]                           # (TM, 1)

        # e[i, j] = LeakyReLU(a_dst.h_i + a_src.h_j), slope 0.2 (PyG default).
        e = s_dst + s_src                                         # (TM, Np)
        e = jnp.maximum(e, 0.2 * e)
        e = e + neg_bias                                          # mask non-edges

        # Masked softmax over source nodes (axis=-1).  Non-edge entries sit at
        # ~-1e9 below the row max, so exp underflows to exactly 0.
        e = e - jnp.max(e, axis=-1, keepdims=True)
        p = jnp.exp(e)
        denom = jnp.sum(p, axis=-1, keepdims=True)
        alpha = p * pl.reciprocal(denom, approx=True)             # EUP reciprocal

        h_h = h_ref[:, hd * f_k:(hd + 1) * f_k]                   # (Np, F) static slice
        head_outs.append(jnp.dot(alpha.astype(jnp.bfloat16), h_h,
                                 preferred_element_type=jnp.float32))

    if concat:
        y = head_outs[0] if heads == 1 else jnp.concatenate(head_outs, axis=-1)
    else:
        y = head_outs[0]
        for t in head_outs[1:]:
            y = y + t
        y = y * (1.0 / heads)

    y = y + bias_ref[...]
    if apply_relu:
        y = jnp.maximum(y, 0.0)
    o_ref[...] = y                             # single lane-dense f32 store


# ---------------------------------------------------------------------------
# Wrapper: one PyG-style GATConv layer (dense masked attention)
# ---------------------------------------------------------------------------
def _choose_tm(n_pad0, hf, out_dim):
    # Keep the resident h, the double-buffered int8 mask slab and the live
    # f32 (TM, Np) temporaries within a conservative VMEM budget (safe on
    # v5e's 16 MiB default scoped limit and v7x's 64 MiB physical VMEM).
    budget = 10 * 1024 * 1024
    resident = n_pad0 * hf * 2 + 4096
    per_row = (2 * n_pad0          # double-buffered int8 mask tile
               + 8 * out_dim       # double-buffered f32 output tile
               + 6 * n_pad0 * 4)   # live f32 (TM, Np) temporaries
    avail = max(budget - resident, 1 * 1024 * 1024)
    tm = (avail // max(per_row, 1)) // 128 * 128
    return int(max(128, min(1024, tm)))


def _vmem_limit_bytes(n_pad, tm, hf, heads, out_dim):
    resident = n_pad * hf * 2 + 2 * hf * heads * 2 + out_dim * 4
    pipelined = 2 * (tm * n_pad * 1 + tm * out_dim * 4)
    temps = 7 * tm * n_pad * 4 + n_pad * heads * 4 + tm * hf * 2
    est = resident + pipelined + temps
    if est <= 16 * 1024 * 1024:          # fits the smallest default (v5e)
        return None
    return int(min(est * 3 // 2, 64 * 1024 * 1024))


def gat_conv_pallas(x, adj_mask, w, att_src, att_dst, bias, *, heads, f_out,
                    concat, apply_relu, tm=None):
    n, c_in = x.shape
    out_dim_true = heads * f_out if concat else f_out

    # Pad the per-head width to 128 lanes when the output would otherwise be
    # narrower than a vreg (layer 2: out_channels=8).  Zero padding of W /
    # att / bias keeps the math identical; extra lanes are sliced off below.
    if concat:
        f_k = f_out
    else:
        f_k = _round_up(f_out, 128)
    hf = heads * f_k
    out_dim_k = hf if concat else f_k

    if f_k != f_out:
        pad = f_k - f_out
        w = jnp.pad(w.reshape(c_in, heads, f_out),
                    ((0, 0), (0, 0), (0, pad))).reshape(c_in, hf)
        att_src = jnp.pad(att_src, ((0, 0), (0, pad)))
        att_dst = jnp.pad(att_dst, ((0, 0), (0, pad)))
        bias = jnp.pad(bias, (0, pad))

    # Row-tile size over destination nodes; multiples of 128 keep every block
    # (int8 / bf16 / f32) lane- and sublane-aligned.  Pad both graph axes.
    n_pad0 = _round_up(n, 128)
    if tm is None:
        tm = _choose_tm(n_pad0, hf, out_dim_k)
    else:
        tm = max(128, _round_up(tm, 128))
    tm = min(tm, n_pad0)
    n_pad = _round_up(n_pad0, tm)
    grid = (n_pad // tm,)

    x_bf = jnp.pad(x.astype(jnp.bfloat16), ((0, n_pad - n), (0, 0)))
    mask_pad = jnp.pad(adj_mask.astype(jnp.int8),
                       ((0, n_pad - n), (0, n_pad - n)))
    w_bf = w.astype(jnp.bfloat16)
    bias2d = bias.reshape(1, out_dim_k).astype(jnp.float32)

    # Block-diagonal (heads*f_k, heads) matrices so the attention-score
    # reductions become a single MXU matmul per side.
    eye = jnp.eye(heads, dtype=jnp.float32)
    a_src_bd = (att_src.astype(jnp.float32)[:, :, None]
                * eye[:, None, :]).reshape(hf, heads).astype(jnp.bfloat16)
    a_dst_bd = (att_dst.astype(jnp.float32)[:, :, None]
                * eye[:, None, :]).reshape(hf, heads).astype(jnp.bfloat16)

    # ---- Kernel 1: h = x @ W, computed once for all nodes ------------------
    h_all = pl.pallas_call(
        _proj_kernel,
        out_shape=jax.ShapeDtypeStruct((n_pad, hf), jnp.bfloat16),
        grid=grid,
        in_specs=[pl.BlockSpec((tm, c_in), lambda i: (i, 0)),
                  pl.BlockSpec((c_in, hf), lambda i: (0, 0))],
        out_specs=pl.BlockSpec((tm, hf), lambda i: (i, 0)),
        compiler_params=pltpu.CompilerParams(
            dimension_semantics=("parallel",)),
    )(x_bf, w_bf)

    # ---- Kernel 2: masked multi-head attention over dst-row tiles ----------
    kernel = functools.partial(_gat_attn_kernel, heads=heads, f_k=f_k, tm=tm,
                               concat=concat, apply_relu=apply_relu)
    out = pl.pallas_call(
        kernel,
        out_shape=jax.ShapeDtypeStruct((n_pad, out_dim_k), jnp.float32),
        grid=grid,
        in_specs=[
            pl.BlockSpec((n_pad, hf), lambda i: (0, 0)),     # h (all nodes, resident)
            pl.BlockSpec((hf, heads), lambda i: (0, 0)),     # block-diag a_src
            pl.BlockSpec((hf, heads), lambda i: (0, 0)),     # block-diag a_dst
            pl.BlockSpec((1, out_dim_k), lambda i: (0, 0)),  # bias
            pl.BlockSpec((tm, n_pad), lambda i: (i, 0)),     # int8 adjacency tile
        ],
        out_specs=pl.BlockSpec((tm, out_dim_k), lambda i: (i, 0)),
        compiler_params=pltpu.CompilerParams(
            dimension_semantics=("parallel",),
            vmem_limit_bytes=_vmem_limit_bytes(n_pad, tm, hf, heads,
                                               out_dim_k)),
    )(h_all, a_src_bd, a_dst_bd, bias2d, mask_pad)

    return out[:n, :out_dim_true]


# ---------------------------------------------------------------------------
# Model glue
# ---------------------------------------------------------------------------
def build_adj_mask(edge_index, num_nodes):
    """Dense int8 (N_dst, N_src) mask with self loops (PyG add_self_loops)."""
    src = edge_index[0]
    dst = edge_index[1]
    adj = jnp.zeros((num_nodes, num_nodes), jnp.int8)
    adj = adj.at[dst, src].set(1)
    idx = jnp.arange(num_nodes)
    adj = adj.at[idx, idx].set(1)
    return adj


def glorot(key, shape):
    fan_in, fan_out = shape[-2], shape[-1]
    limit = jnp.sqrt(6.0 / (fan_in + fan_out))
    return jax.random.uniform(key, shape, jnp.float32, -limit, limit)


def init_params(key, in_channels, out_channels, heads, hidden=32):
    k = jax.random.split(key, 8)
    params = {
        # conv1: GATConv(in_channels, 32, heads=heads, concat=True)
        "w1": glorot(k[0], (in_channels, heads * hidden)),
        "a_src1": glorot(k[1], (heads, hidden)),
        "a_dst1": glorot(k[2], (heads, hidden)),
        "b1": jnp.zeros((heads * hidden,), jnp.float32),
        # conv2: GATConv(32*heads, out_channels, heads=1, concat=False)
        "w2": glorot(k[3], (heads * hidden, 1 * out_channels)),
        "a_src2": glorot(k[4], (1, out_channels)),
        "a_dst2": glorot(k[5], (1, out_channels)),
        "b2": jnp.zeros((out_channels,), jnp.float32),
        # decoder params exist in __init__ but are unused by forward()
        "dec_w1": glorot(k[6], (2 * out_channels, 64)),
        "dec_b1": jnp.zeros((64,), jnp.float32),
        "dec_w2": glorot(k[7], (64, 1)),
        "dec_b2": jnp.zeros((1,), jnp.float32),
    }
    return params


def gat_link_predictor_forward(params, x, edge_index, *, heads, hidden=32,
                               out_channels=None, tm=None):
    n = x.shape[0]
    adj = build_adj_mask(edge_index, n)
    # x = relu(conv1(x, edge_index))  -- ReLU fused into kernel of layer 1
    h1 = gat_conv_pallas(x, adj, params["w1"], params["a_src1"],
                         params["a_dst1"], params["b1"],
                         heads=heads, f_out=hidden, concat=True,
                         apply_relu=True, tm=tm)
    # x = conv2(x, edge_index)
    z = gat_conv_pallas(h1, adj, params["w2"], params["a_src2"],
                        params["a_dst2"], params["b2"],
                        heads=1, f_out=out_channels, concat=False,
                        apply_relu=False, tm=tm)
    return z
    # TODO(synk): decode() (edge-pair MLP scorer) is not part of forward(); omitted.


if __name__ == "__main__":
    key = jax.random.PRNGKey(0)
    k_param, k_x, k_src, k_dst = jax.random.split(key, 4)

    num_nodes = 200         # pads to 256; tm=128 -> grid=(2,) exercises tiling
    in_channels = 8
    out_channels = 8
    heads = 4
    num_edges = 600

    params = init_params(k_param, in_channels, out_channels, heads)

    x = jax.random.normal(k_x, (num_nodes, in_channels), jnp.float32)
    edge_index = jnp.stack([
        jax.random.randint(k_src, (num_edges,), 0, num_nodes),
        jax.random.randint(k_dst, (num_edges,), 0, num_nodes),
    ], axis=0)

    z = gat_link_predictor_forward(params, x, edge_index, heads=heads,
                                   hidden=32, out_channels=out_channels,
                                   tm=128)
    z = jax.block_until_ready(z)
    assert z.shape == (num_nodes, out_channels)
    assert bool(jnp.all(jnp.isfinite(z)))
    print("KERNEL_OK")
</pallas_src>

<mosaic_0001>
module attributes {stable_mosaic.version = 11 : i64} {
  func.func @_proj_kernel(%arg0: i32, %arg1: memref<128x8xbf16, #tpu.memory_space<vmem>>, %arg2: memref<8x128xbf16, #tpu.memory_space<vmem>>, %arg3: memref<128x128xbf16, #tpu.memory_space<vmem>>) attributes {dimension_semantics = [#tpu.dimension_semantics<parallel>], iteration_bounds = array<i64: 2>, scalar_prefetch = 0 : i64, scratch_operands = 0 : i64, tpu.core_type = #tpu.core_type<tc>, window_params = [{transform_indices = @transform_0, window_bounds = array<i64: 128, 8>}, {pipeline_mode = #tpu.pipeline_mode<synchronous>, transform_indices = @transform_1, window_bounds = array<i64: 8, 128>}, {transform_indices = @transform_2, window_bounds = array<i64: 128, 128>}]} {
    %c0 = arith.constant 0 : index
    %c0_0 = arith.constant 0 : index
    %0 = vector.load %arg1[%c0, %c0_0] : memref<128x8xbf16, #tpu.memory_space<vmem>>, vector<128x8xbf16>
    %c0_1 = arith.constant 0 : index
    %c0_2 = arith.constant 0 : index
    %1 = vector.load %arg2[%c0_1, %c0_2] : memref<8x128xbf16, #tpu.memory_space<vmem>>, vector<8x128xbf16>
    %cst = arith.constant dense<0.000000e+00> : vector<128x128xf32>
    %2 = tpu.matmul %0, %1, %cst {dimension_numbers = #tpu.dot_dimension_numbers<[1], [0], [0], [1], [0, 0, 1, 1], [], []>} : vector<128x8xbf16>, vector<8x128xbf16>, vector<128x128xf32> -> vector<128x128xf32>
    %3 = arith.truncf %2 : vector<128x128xf32> to vector<128x128xbf16>
    %c0_3 = arith.constant 0 : index
    %c0_4 = arith.constant 0 : index
    %4 = vector.load %arg3[%c0_3, %c0_4] : memref<128x128xbf16, #tpu.memory_space<vmem>>, vector<128x128xbf16>
    tpu.vector_store %arg3[%c0_3, %c0_4], %3 {strides = array<i32>} : memref<128x128xbf16, #tpu.memory_space<vmem>>, vector<128x128xbf16>,
    return
  }
  func.func @transform_0(%arg0: i32) -> (i32, i32) {
    %c0_i32 = arith.constant 0 : i32
    %c0_i32_0 = arith.constant 0 : i32
    return %arg0, %c0_i32 : i32, i32
  }
  func.func @transform_1(%arg0: i32) -> (i32, i32) {
    %c0_i32 = arith.constant 0 : i32
    %c0_i32_0 = arith.constant 0 : i32
    %c0_i32_1 = arith.constant 0 : i32
    return %c0_i32, %c0_i32_0 : i32, i32
  }
  func.func @transform_2(%arg0: i32) -> (i32, i32) {
    %c0_i32 = arith.constant 0 : i32
    %c0_i32_0 = arith.constant 0 : i32
    return %arg0, %c0_i32 : i32, i32
  }
}

</mosaic_0001>

<bundles_post_ra>
// kernel: tpu_custom_call.1
= control target key start
LH: loop header
LB: loop body
LE: loop exit
PB: predicated region body
PF: predicated region fallthrough
CT: control target
= control target key end

     0   :  { %7 = vsyncpa [#allocation3], 0  ;;  %s872_s0 = inlined_call_operand.vmem [shape: bf16[256,8], index: 0, kind: input, shape index: {}]   ;;  %s873_s1 = inlined_call_operand.vmem [shape: bf16[8,128], index: 1, kind: input, shape index: {}]   ;;  %s874_s2 = inlined_call_operand.hbm [shape: bf16[256,128], index: 2, kind: output, shape index: {}]  }
   0x1   :  { %9 = vsyncpa [#allocation3 + $0x1], 0  ;;  %s755_s9 = smov 0   ;;  %s757_s10 = smov 0  }
   0x2   :  { %s759_s11 = smov 0   ;;  %s761_s12 = smov 0  }
   0x3 LB: > { %s776_s13 = sadd.s32 4294967295, %s735_s12   ;;  %s485_s14 = sadd.s32 4294967294, %s735_s12   ;;  %s735_s12 = sphi %s761_s12, %s880_s12   ;;  %s731_s11 = sphi %s759_s11, %s879_s11   ;;  %s727_s10 = sphi %s757_s10, %s878_s10   ;;  %s723_s9 = sphi %s755_s9, %s877_s9  }
   0x4   : > { %s780_s15 = sadd.s32 1, %s735_s12   ;;  %s69_s16 = sadd.s32 1, %s731_s11 }
   0x5   : > { %s66_s17 = ssub.s32 %s735_s12, %s780_s15  ;;  %p79_p0 = scmp.ne.s32.totalorder %s731_s11, %s727_s10 }
   0x6   : > { %p67_p1 = scmp.eq.s32.totalorder %s66_s17, 0  ;;  %p80_p2 = scmp.eq.s32.totalorder %s776_s13, 1 }
   0x7   : > { %p85_p3 = scmp.ne.s32.totalorder %s727_s10, %s723_s9  ;;  %p86_p4 = scmp.eq.s32.totalorder %s485_s14, 1 }
   0x8   : > { %s791_s18 = scalar_select %p67_p1, %s731_s11, %s69_s16  }
   0x9   : > { %p793_p5 = por %p80_p2, %p79_p0  ;;  %p797_p6 = por %p86_p4, %p85_p3 }
   0xa   : > { %p488_p7 = scmp.ge.s32.totalorder %s735_s12, 1  ;;  %p116_p8 = scmp.lt.s32.totalorder %s735_s12, 3 }
   0xc   : > { %p117_p9 = pnand %p488_p7, %p116_p8 }
   0xd   : > { %v162_v0 = vld [vmem:[%s873_s1] sm:$0xf] (!%p117_p9)  ;;  %vm228_vm0 = vcmask (!%p117_p9), 1043456   ;;  %s490_s23 = sshll.u32 (!%p117_p9), %s776_s13, 4  ;;  %vm203_vm1 = vcmask (!%p117_p9), 64512   ;;  %s135_s28 = sand.u32 (!%p117_p9), 1, %s727_s10  }
   0xe   : > { %120 = sbr.rel (%p117_p9) target bundleno = 267 (0x10b), region = 28  ;;  %622 = vmatprep.subr.msk.bf16.mxu0 (!%p117_p9), %vm228_vm0, %v162_v0  ;;  %623 = vmatprep.subr.msk.bf16.mxu1 (!%p117_p9), %vm228_vm0, %v162_v0  ;;  %v230_v1 = vsel (!%p117_p9), %vm228_vm0, %v162_v0, 0  ;;  %p139_p10 = scmp.lt.s32.totalorder (!%p117_p9), %s490_s23, 31 }
   0xf   : > { %603 = vmatpush3.bf16.msra.mxu0 (!%p117_p9), %v230_v1  ;;  %621 = vmatpush3.bf16.msra.mxu1 (!%p117_p9), %v230_v1  ;;  %s489_s29 = sshll.u32 (!%p117_p9), %s135_s28, 6  ;;  %s545_s3 = sshll.u32 (!%p117_p9), %s776_s13, 10 }
  0x10   : > { %s137_s30 = scalar_lea.vmem (!%p117_p9), [#allocation2], %s489_s29  ;;  %s825_s7 = scalar_lea.hbm (!%p117_p9), %s874_s2, %s545_s3 }
  0x11   : > { %s423_s4 = sshll.u32 (!%p117_p9), %s137_s30, 4  ;;  %s831_s8 = scalar_lea.sflag (!%p117_p9), [#allocation3], %s135_s28  ;;  %s827_s4 = int_to_ptr.vmem [resolvable:$true] %s423_s4 }
  0x12   : > { %s673_s13 = scalar_lea.vmem (!%p117_p9), %s827_s4, 1024  ;;  %s737_s14 = smov (!%p117_p9), [#allocation2]  }
  0x13   : > { %p674_p11 = scmp.ne.s32.totalorder (!%p117_p9), %s827_s4, %s673_s13  ;;  %s677_s16 = sshll.u32 (!%p117_p9), %s737_s14, 4  ;;  %s678_s16 = int_to_ptr.vmem [resolvable:$false] %s677_s16 }
  0x14   : > { %s679_s17 = scalar_lea.vmem (!%p117_p9), %s678_s16, 2048  ;;  %p680_p0 = scmp.lt.s32.totalorder (!%p117_p9), %s827_s4, %s678_s16 }
  0x15   : > { %s882_s23 = smov (!%p139_p10, %s490_s23), 31  ;;  %p675_p12 = pnand %p674_p11, %p793_p5 }
  0x16   : > { %s491_s24 = sshll.u32 %s882_s23, 2  ;;  %p681_p1 = scmp.lt.s32.totalorder %s679_s17, %s673_s13 }
  0x17   : > { %s142_s27 = scalar_lea.vmem %s872_s0, %s491_s24  ;;  %p676_p13 = pneg %p675_p12 }
  0x18   : > { %v665_v2 = vld [vmem:[%s142_s27] sm:$0xff]   ;;  %v667_v4 = vld [vmem:[%s142_s27 + $0x8] sm:$0xff]   ;;  %v669_v6 = vld [vmem:[%s142_s27 + $0x10] sm:$0xff]   ;;  %p682_p2 = por %p681_p1, %p680_p0 }
  0x19   : > { %v666_v3 = vld [vmem:[%s142_s27 + $0x20] sm:$0xff]   ;;  %604 = vmatprep.mubr.msk.bf16.mxu0 %vm203_vm1, %v665_v2  ;;  %v668_v5 = vld [vmem:[%s142_s27 + $0x28] sm:$0xff]   ;;  %v670_v7 = vld [vmem:[%s142_s27 + $0x30] sm:$0xff]  }
  0x1a   : > { %612 = vmatprep.mubr.msk.bf16.mxu1 %vm203_vm1, %v666_v3  ;;  %605 = vmatmul.mubr.msk.bf16.vlgmr.msra.gmra.mrb[0].mxu0 %vm203_vm1, %v667_v4  ;;  %v671_v8 = vld [vmem:[%s142_s27 + $0x18] sm:$0xff]   ;;  %p683_p3 = pnand %p682_p2, %p676_p13 }
  0x1b   : > { %613 = vmatmul.mubr.msk.bf16.vlgmr.msra.gmra.mrb[0].mxu1 %vm203_vm1, %v668_v5  ;;  %608 = vmatprep.mubr.msk.bf16.mxu0 %vm203_vm1, %v669_v6  ;;  %v672_v9 = vld [vmem:[%s142_s27 + $0x38] sm:$0xff]  }
  0x1c   : > { %616 = vmatprep.mubr.msk.bf16.mxu1 %vm203_vm1, %v670_v7 }
  0x22   : > { %609 = vmatmul.mubr.msk.bf16.gmra.mrb[4].mxu0 %vm203_vm1, %v671_v8 }
  0x23   : > { %617 = vmatmul.mubr.msk.bf16.gmra.mrb[4].mxu1 %vm203_vm1, %v672_v9 }
  0xed   : > { %v606_v10 = vpop.f32.mrb[0].mxu0 }
  0xee   : > { %v614_v11 = vpop.f32.mrb[0].mxu1  ;;  %v266_v12 = vpop.f32.mrb[1].mxu0 }
  0xef   : > { %v298_v13 = vpop.f32.mrb[1].mxu1  ;;  %v607_v14 = vpop.f32.mrb[2].mxu0 }
  0xf0   : > { %v554_v15 = vpack.c.bf16 %v607_v14, %v606_v10  ;;  %v615_v16 = vpop.f32.mrb[2].mxu1  ;;  %v269_v17 = vpop.f32.mrb[3].mxu0 }
  0xf1   : > { %v574_v18 = vpack.c.bf16 %v615_v16, %v614_v11  ;;  %v549_v19 = vpack.c.bf16 %v269_v17, %v266_v12  ;;  %v301_v20 = vpop.f32.mrb[3].mxu1 }
  0xf2   : > { %586 = vst [vmem:[%s137_s30 + $0x8] sm:$0xff] %v554_v15   ;;  %v569_v21 = vpack.c.bf16 %v301_v20, %v298_v13 }
  0xf3   : > { %590 = vst [vmem:[%s137_s30 + $0x28] sm:$0xff] %v574_v18   ;;  %550 = vst [vmem:[%s137_s30] sm:$0xff] %v549_v19  }
  0xf4   : > { %589 = vst [vmem:[%s137_s30 + $0x20] sm:$0xff] %v569_v21  }
  0xf5   : > { %v610_v22 = vpop.f32.mrb[4].mxu0 }
  0xf6   : > { %v618_v23 = vpop.f32.mrb[4].mxu1  ;;  %v282_v24 = vpop.f32.mrb[5].mxu0 }
  0xf7   : > { %v314_v25 = vpop.f32.mrb[5].mxu1  ;;  %v611_v26 = vpop.f32.mrb[6].mxu0 }
  0xf8   : > { %v564_v27 = vpack.c.bf16 %v611_v26, %v610_v22  ;;  %v619_v28 = vpop.f32.mrb[6].mxu1  ;;  %v285_v29 = vpop.f32.mrb[7].mxu0 }
  0xf9   : > { %v584_v30 = vpack.c.bf16 %v619_v28, %v618_v23  ;;  %v559_v31 = vpack.c.bf16 %v285_v29, %v282_v24  ;;  %v317_v32 = vpop.f32.mrb[7].mxu1 }
  0xfa   : > { %588 = vst [vmem:[%s137_s30 + $0x18] sm:$0xff] %v564_v27   ;;  %v579_v33 = vpack.c.bf16 %v317_v32, %v314_v25 }
  0xfb   : > { %592 = vst [vmem:[%s137_s30 + $0x38] sm:$0xff] %v584_v30   ;;  %587 = vst [vmem:[%s137_s30 + $0x10] sm:$0xff] %v559_v31  }
  0xfc   : > { %591 = vst [vmem:[%s137_s30 + $0x30] sm:$0xff] %v579_v33  }
  0xfd   : > { %686 = shalt.err (!%p683_p3)
}
  0xfe   : > { %s687_s21 = scalar_lea.hbm %s825_s7, 1024  ;;  %s691_s24 = scalar_lea.hbm %s874_s2, 2048 }
  0xff   : > { %p688_p4 = scmp.ne.s32.totalorder %s825_s7, %s687_s21  ;;  %p692_p9 = scmp.lt.u32.totalorder %s825_s7, %s874_s2 }
 0x100   : > { %p693_p10 = scmp.lt.u32.totalorder %s691_s24, %s687_s21  ;;  %p695_p12 = scmp.lt.u32.totalorder %s687_s21, %s825_s7 }
 0x101   : > { %p689_p7 = pnand %p688_p4, %p793_p5 }
 0x102   : > { %p694_p11 = por %p693_p10, %p692_p9 }
 0x103   : > { %p690_p8 = pneg %p689_p7 }
 0x104   : > { %p696_p13 = por %p695_p12, %p694_p11 }
 0x106   : > { %p697_p0 = pnand %p696_p13, %p690_p8 }
 0x108   : > { %700 = shalt.err (!%p697_p0)
}
 0x109   : > { %s738_s27 = smov 64   ;;  %s739_s28 = smov 4  }
 0x10a   : > { %624 = dma.vmem_to_hbm [thread:$0]  (%p793_p5), %s827_s4, 1024, %s825_s7, %s831_s8, %s738_s27, %s738_s27, %s739_s28  }
 0x10b PF: > { %p630_p1 = scmp.ge.s32.totalorder %s735_s12, 2  ;;  %s438_s29 = sand.u32 1, %s723_s9  }
 0x10c   : > { %s439_s30 = scalar_lea.sflag [#allocation3], %s438_s29 }
 0x10d   : > { %p627_p2 = pnand %p630_p1, %p797_p6 }
 0x10f   : > { %718 = dma.done.wait (!%p627_p2), %s439_s30, 1024  }
 0x110   : > { %720 = vsyncadd (!%p627_p2), %s439_s30, 4294966272  ;;  %p12_p3 = scmp.ge.s32.totalorder %s780_s15, 4   ;;  %s877_s9 = smov %s727_s10 }
 0x111   : > { %s878_s10 = smov %s731_s11  ;;  %s879_s11 = smov %s791_s18 }
 0x112   : > { %s880_s12 = smov %s780_s15  ;;  %14 = sbr.rel (!%p12_p3) target bundleno = 3 (0x3), region = 63 }
 0x119   :  { %444 = vsyncpa [#allocation3], 1 }
 0x11a   :  { %446 = vsyncpa [#allocation3 + $0x1], 1 }

</bundles_post_ra>
